<compile_context>
chip_gen: v7x
topology: tpu7x:2x2x1
jax: 0.10.0
libtpu: 0.0.40
codegen_flags: <defaults>
</compile_context>

<pallas_src>
import functools

import jax
import jax.numpy as jnp
from jax.experimental import pallas as pl
from jax.experimental.pallas import tpu as pltpu


def _round_up(x, m):
    return (x + m - 1) // m * m


def _self_fusion_kernel(y_ref, w1_ref, b1_ref, w2_ref, b2_ref,
                        gamma_ref, beta_ref, out_ref, acc_ref, *, h_real):
    """One (row-tile, FF-chunk) grid step.

    acc_ref accumulates sum_k relu(y @ W1[:, k] + b1[k]) @ W2[k, :] in f32.
    The residual add and LayerNorm run once, on the final FF chunk.
    """
    k = pl.program_id(1)

    @pl.when(k == 0)
    def _init():
        acc_ref[...] = jnp.zeros_like(acc_ref)

    # --- MatrixBlock partial: Linear -> ReLU -> Linear on the MXU (bf16 in, f32 acc)
    y_mx = y_ref[...].astype(jnp.bfloat16)                              # (TM, Hp)
    h = jnp.dot(y_mx, w1_ref[...], preferred_element_type=jnp.float32)  # (TM, TFF)
    h = jnp.maximum(h + b1_ref[...], 0.0)                               # bias + ReLU (VPU)
    acc_ref[...] += jnp.dot(h.astype(jnp.bfloat16), w2_ref[...],
                            preferred_element_type=jnp.float32)         # (TM, Hp)

    # --- Finalize: residual + LayerNorm over the real HIDDEN_SIZE columns ---
    @pl.when(k == pl.num_programs(1) - 1)
    def _finalize():
        r = y_ref[...].astype(jnp.float32) + acc_ref[...] + b2_ref[...]
        # Padded H columns of y / acc / b2 are zero, so full-width sums equal
        # the sums over the real H columns; divide by the real H (one pass).
        inv_h = 1.0 / h_real
        s = jnp.sum(r, axis=-1, keepdims=True)
        ss = jnp.sum(r * r, axis=-1, keepdims=True)
        mean = s * inv_h
        var = jnp.maximum(ss * inv_h - mean * mean, 0.0)
        inv = jax.lax.rsqrt(var + 1e-6)                                 # EUP slot
        out_ref[...] = ((r - mean) * inv * gamma_ref[...]
                        + beta_ref[...]).astype(out_ref.dtype)


def matrix_self_fusion(y, w1, b1, w2, b2, gamma, beta, *,
                       tile_m=256, tile_ff=512, input_bf16=True):
    """y: (B, S, H).  Returns (B, S, H) in y.dtype."""
    B, S, H = y.shape
    FF = w1.shape[1]
    N = B * S

    # --- padded sizes / tile choice -----------------------------------------
    H_pad = _round_up(H, 128)                                # lane-dense stores
    tile_ff = max(256, _round_up(min(tile_ff, FF), 256))     # 256-multiple FF chunks
    FF_pad = _round_up(FF, tile_ff)

    tile_m = max(8, _round_up(tile_m, 8))
    if N >= 16:
        # keep >= 2 row-grid steps so ("parallel", ...) can use both v7x TCs
        tile_m = min(tile_m, _round_up(pl.cdiv(N, 2), 8))
    else:
        tile_m = 8
    N_pad = _round_up(N, tile_m)

    # --- zero-pad operands (kernel divides LayerNorm stats by the real H) ---
    act_dtype = jnp.bfloat16 if input_bf16 else jnp.float32
    y2 = jnp.pad(y.reshape(N, H).astype(act_dtype),
                 ((0, N_pad - N), (0, H_pad - H)))
    w1p = jnp.pad(w1.astype(jnp.bfloat16), ((0, H_pad - H), (0, FF_pad - FF)))
    b1p = jnp.pad(b1.reshape(1, FF).astype(jnp.float32), ((0, 0), (0, FF_pad - FF)))
    w2p = jnp.pad(w2.astype(jnp.bfloat16), ((0, FF_pad - FF), (0, H_pad - H)))
    b2p = jnp.pad(b2.reshape(1, H).astype(jnp.float32), ((0, 0), (0, H_pad - H)))
    gp = jnp.pad(gamma.reshape(1, H).astype(jnp.float32), ((0, 0), (0, H_pad - H)))
    bp = jnp.pad(beta.reshape(1, H).astype(jnp.float32), ((0, 0), (0, H_pad - H)))

    grid = (N_pad // tile_m, FF_pad // tile_ff)

    in_specs = [
        pl.BlockSpec((tile_m, H_pad), lambda i, k: (i, 0)),    # y row tile
        pl.BlockSpec((H_pad, tile_ff), lambda i, k: (0, k)),   # W1 FF-chunk
        pl.BlockSpec((1, tile_ff), lambda i, k: (0, k)),       # b1 FF-chunk
        pl.BlockSpec((tile_ff, H_pad), lambda i, k: (k, 0)),   # W2 FF-chunk
        pl.BlockSpec((1, H_pad), lambda i, k: (0, 0)),         # b2
        pl.BlockSpec((1, H_pad), lambda i, k: (0, 0)),         # gamma
        pl.BlockSpec((1, H_pad), lambda i, k: (0, 0)),         # beta
    ]
    out_spec = pl.BlockSpec((tile_m, H_pad), lambda i, k: (i, 0))

    # --- VMEM budget (double-buffered tiles + scratch) and per-chip limit ---
    act_b = 2 if input_bf16 else 4
    needed = (2 * 2 * (H_pad * tile_ff * 2)            # W1 + W2 chunks, 2-deep, bf16
              + 2 * tile_m * H_pad * act_b             # y tile, 2-deep
              + 2 * tile_m * H_pad * 4                 # out tile, 2-deep
              + tile_m * H_pad * 4                     # f32 accumulator scratch
              + tile_m * tile_ff * 8                   # h (f32) + bf16 copy
              + 2 * (tile_ff + 3 * H_pad) * 4)         # biases / gamma / beta
    try:
        vmem_cap = pltpu.get_tpu_info().vmem_capacity_bytes
    except Exception:
        vmem_cap = 64 << 20                            # v7x per-core (smallest)
    # ~15% headroom for compiler scratch: ~54 MiB on v7x, ~108 MiB on v5e/v6e.
    vmem_limit = int(min(int(0.85 * vmem_cap), max(2 * needed, 32 << 20)))

    cost = pl.CostEstimate(
        flops=int(4 * N_pad * H_pad * FF_pad),         # two matmuls
        transcendentals=int(N_pad),                    # one rsqrt per row
        bytes_accessed=int(N_pad * H_pad * (act_b + 4)
                           + 2 * H_pad * FF_pad * 2
                           + (FF_pad + 3 * H_pad) * 4),
    )

    kernel = functools.partial(_self_fusion_kernel, h_real=H)

    out = pl.pallas_call(
        kernel,
        out_shape=jax.ShapeDtypeStruct((N_pad, H_pad), y.dtype),
        grid_spec=pltpu.PrefetchScalarGridSpec(
            num_scalar_prefetch=0,
            grid=grid,
            in_specs=in_specs,
            out_specs=out_spec,
            scratch_shapes=[pltpu.VMEM((tile_m, H_pad), jnp.float32)],
        ),
        compiler_params=pltpu.CompilerParams(
            dimension_semantics=("parallel", "arbitrary"),
            vmem_limit_bytes=vmem_limit,
        ),
        cost_estimate=cost,
    )(y2, w1p, b1p, w2p, b2p, gp, bp)

    return out[:N, :H].reshape(B, S, H)


def _reference(y, w1, b1, w2, b2, gamma, beta):
    h = jnp.maximum(y @ w1 + b1, 0.0)
    f = h @ w2 + b2
    r = y + f
    mean = jnp.mean(r, axis=-1, keepdims=True)
    var = jnp.mean((r - mean) ** 2, axis=-1, keepdims=True)
    return (r - mean) * jax.lax.rsqrt(var + 1e-6) * gamma + beta


if __name__ == "__main__":
    B, S, H, FF = 2, 8, 32, 64   # batch, seq, HIDDEN_SIZE, feed-forward size

    key = jax.random.PRNGKey(0)
    k_y, k_w1, k_b1, k_w2, k_b2 = jax.random.split(key, 5)

    y = jax.random.normal(k_y, (B, S, H), dtype=jnp.float32)

    # deterministic parameter init (Xavier-ish scaling)
    w1 = jax.random.normal(k_w1, (H, FF), dtype=jnp.float32) * (1.0 / H ** 0.5)
    b1 = jax.random.normal(k_b1, (FF,), dtype=jnp.float32) * 0.01
    w2 = jax.random.normal(k_w2, (FF, H), dtype=jnp.float32) * (1.0 / FF ** 0.5)
    b2 = jax.random.normal(k_b2, (H,), dtype=jnp.float32) * 0.01
    gamma = jnp.ones((H,), dtype=jnp.float32)
    beta = jnp.zeros((H,), dtype=jnp.float32)

    out = matrix_self_fusion(y, w1, b1, w2, b2, gamma, beta)
    out = jax.block_until_ready(out)

    ref = _reference(y, w1, b1, w2, b2, gamma, beta)
    assert out.shape == (B, S, H)
    # bf16 activations + bf16 MXU weights vs. pure-f32 reference -> relaxed
    # tolerance (expected, accepted precision loss of the bf16 matmul path).
    assert jnp.allclose(out, ref, atol=4e-2, rtol=4e-2), "mismatch vs reference"

    print("KERNEL_OK")
</pallas_src>

<mosaic_0001>
module attributes {stable_mosaic.version = 11 : i64} {
  func.func @_self_fusion_kernel(%arg0: i32, %arg1: i32, %arg2: memref<8x128xbf16, #tpu.memory_space<vmem>>, %arg3: memref<128x256xbf16, #tpu.memory_space<vmem>>, %arg4: memref<1x256xf32, #tpu.memory_space<vmem>>, %arg5: memref<256x128xbf16, #tpu.memory_space<vmem>>, %arg6: memref<1x128xf32, #tpu.memory_space<vmem>>, %arg7: memref<1x128xf32, #tpu.memory_space<vmem>>, %arg8: memref<1x128xf32, #tpu.memory_space<vmem>>, %arg9: memref<8x128xf32, #tpu.memory_space<vmem>>, %arg10: memref<8x128xf32, #tpu.memory_space<vmem>>) attributes {dimension_semantics = [#tpu.dimension_semantics<parallel>, #tpu.dimension_semantics<arbitrary>], iteration_bounds = array<i64: 2, 1>, scalar_prefetch = 0 : i64, scratch_operands = 1 : i64, tpu.core_type = #tpu.core_type<tc>, window_params = [{transform_indices = @transform_0, window_bounds = array<i64: 8, 128>}, {transform_indices = @transform_1, window_bounds = array<i64: 128, 256>}, {transform_indices = @transform_2, window_bounds = array<i64: 1, 256>}, {transform_indices = @transform_3, window_bounds = array<i64: 256, 128>}, {pipeline_mode = #tpu.pipeline_mode<synchronous>, transform_indices = @transform_4, window_bounds = array<i64: 1, 128>}, {pipeline_mode = #tpu.pipeline_mode<synchronous>, transform_indices = @transform_5, window_bounds = array<i64: 1, 128>}, {pipeline_mode = #tpu.pipeline_mode<synchronous>, transform_indices = @transform_6, window_bounds = array<i64: 1, 128>}, {transform_indices = @transform_7, window_bounds = array<i64: 8, 128>}]} {
    %c0_i32 = arith.constant 0 : i32
    %0 = arith.cmpi eq, %arg1, %c0_i32 : i32
    %1 = arith.extui %0 : i1 to i32
    %c0_i32_0 = arith.constant 0 : i32
    %2 = arith.cmpi ne, %1, %c0_i32_0 : i32
    scf.if %2 {
      %cst_16 = arith.constant 0.000000e+00 : f32
      %20 = vector.broadcast %cst_16 : f32 to vector<8x128xf32>
      %c0_17 = arith.constant 0 : index
      %c0_18 = arith.constant 0 : index
      %21 = vector.load %arg10[%c0_17, %c0_18] : memref<8x128xf32, #tpu.memory_space<vmem>>, vector<8x128xf32>
      tpu.vector_store %arg10[%c0_17, %c0_18], %20 {strides = array<i32>} : memref<8x128xf32, #tpu.memory_space<vmem>>, vector<8x128xf32>,
    } else {
    }
    %c0 = arith.constant 0 : index
    %c0_1 = arith.constant 0 : index
    %3 = vector.load %arg2[%c0, %c0_1] : memref<8x128xbf16, #tpu.memory_space<vmem>>, vector<8x128xbf16>
    %c0_2 = arith.constant 0 : index
    %c0_3 = arith.constant 0 : index
    %4 = vector.load %arg3[%c0_2, %c0_3] : memref<128x256xbf16, #tpu.memory_space<vmem>>, vector<128x256xbf16>
    %cst = arith.constant dense<0.000000e+00> : vector<8x256xf32>
    %5 = tpu.matmul %3, %4, %cst {dimension_numbers = #tpu.dot_dimension_numbers<[1], [0], [0], [1], [0, 0, 1, 1], [], []>} : vector<8x128xbf16>, vector<128x256xbf16>, vector<8x256xf32> -> vector<8x256xf32>
    %c0_4 = arith.constant 0 : index
    %c0_5 = arith.constant 0 : index
    %6 = vector.load %arg4[%c0_4, %c0_5] : memref<1x256xf32, #tpu.memory_space<vmem>>, vector<1x256xf32>
    %7 = vector.broadcast %6 : vector<1x256xf32> to vector<8x256xf32>
    %8 = arith.addf %5, %7 : vector<8x256xf32>
    %cst_6 = arith.constant 0.000000e+00 : f32
    %9 = vector.broadcast %cst_6 : f32 to vector<8x256xf32>
    %10 = arith.maximumf %8, %9 : vector<8x256xf32>
    %c0_7 = arith.constant 0 : index
    %c0_8 = arith.constant 0 : index
    %11 = vector.load %arg10[%c0_7, %c0_8] : memref<8x128xf32, #tpu.memory_space<vmem>>, vector<8x128xf32>
    %12 = arith.truncf %10 : vector<8x256xf32> to vector<8x256xbf16>
    %c0_9 = arith.constant 0 : index
    %c0_10 = arith.constant 0 : index
    %13 = vector.load %arg5[%c0_9, %c0_10] : memref<256x128xbf16, #tpu.memory_space<vmem>>, vector<256x128xbf16>
    %cst_11 = arith.constant dense<0.000000e+00> : vector<8x128xf32>
    %14 = tpu.matmul %12, %13, %cst_11 {dimension_numbers = #tpu.dot_dimension_numbers<[1], [0], [0], [1], [0, 0, 1, 1], [], []>} : vector<8x256xbf16>, vector<256x128xbf16>, vector<8x128xf32> -> vector<8x128xf32>
    %15 = arith.addf %11, %14 : vector<8x128xf32>
    %c0_12 = arith.constant 0 : index
    %c0_13 = arith.constant 0 : index
    %16 = vector.load %arg10[%c0_12, %c0_13] : memref<8x128xf32, #tpu.memory_space<vmem>>, vector<8x128xf32>
    tpu.vector_store %arg10[%c0_12, %c0_13], %15 {strides = array<i32>} : memref<8x128xf32, #tpu.memory_space<vmem>>, vector<8x128xf32>,
    %c0_i32_14 = arith.constant 0 : i32
    %17 = arith.cmpi eq, %arg1, %c0_i32_14 : i32
    %18 = arith.extui %17 : i1 to i32
    %c0_i32_15 = arith.constant 0 : i32
    %19 = arith.cmpi ne, %18, %c0_i32_15 : i32
    scf.if %19 {
      %c0_16 = arith.constant 0 : index
      %c0_17 = arith.constant 0 : index
      %20 = vector.load %arg2[%c0_16, %c0_17] : memref<8x128xbf16, #tpu.memory_space<vmem>>, vector<8x128xbf16>
      %21 = arith.extf %20 : vector<8x128xbf16> to vector<8x128xf32>
      %c0_18 = arith.constant 0 : index
      %c0_19 = arith.constant 0 : index
      %22 = vector.load %arg10[%c0_18, %c0_19] : memref<8x128xf32, #tpu.memory_space<vmem>>, vector<8x128xf32>
      %23 = arith.addf %21, %22 : vector<8x128xf32>
      %c0_20 = arith.constant 0 : index
      %c0_21 = arith.constant 0 : index
      %24 = vector.load %arg6[%c0_20, %c0_21] : memref<1x128xf32, #tpu.memory_space<vmem>>, vector<1x128xf32>
      %25 = vector.broadcast %24 : vector<1x128xf32> to vector<8x128xf32>
      %26 = arith.addf %23, %25 : vector<8x128xf32>
      %cst_22 = arith.constant dense<0.000000e+00> : vector<8xf32>
      %27 = vector.multi_reduction <add>, %26, %cst_22 [1] : vector<8x128xf32> to vector<8xf32>
      %28 = vector.shape_cast %27 : vector<8xf32> to vector<8x1xf32>
      %29 = arith.mulf %26, %26 : vector<8x128xf32>
      %cst_23 = arith.constant dense<0.000000e+00> : vector<8xf32>
      %30 = vector.multi_reduction <add>, %29, %cst_23 [1] : vector<8x128xf32> to vector<8xf32>
      %31 = vector.shape_cast %30 : vector<8xf32> to vector<8x1xf32>
      %cst_24 = arith.constant 3.125000e-02 : f32
      %32 = vector.broadcast %cst_24 : f32 to vector<8x1xf32>
      %33 = arith.mulf %28, %32 : vector<8x1xf32>
      %cst_25 = arith.constant 3.125000e-02 : f32
      %34 = vector.broadcast %cst_25 : f32 to vector<8x1xf32>
      %35 = arith.mulf %31, %34 : vector<8x1xf32>
      %36 = arith.mulf %33, %33 : vector<8x1xf32>
      %37 = arith.subf %35, %36 : vector<8x1xf32>
      %cst_26 = arith.constant 0.000000e+00 : f32
      %38 = vector.broadcast %cst_26 : f32 to vector<8x1xf32>
      %39 = arith.maximumf %37, %38 : vector<8x1xf32>
      %cst_27 = arith.constant 9.99999997E-7 : f32
      %40 = vector.broadcast %cst_27 : f32 to vector<8x1xf32>
      %41 = arith.addf %39, %40 : vector<8x1xf32>
      %42 = math.rsqrt %41 : vector<8x1xf32>
      %43 = vector.broadcast %33 : vector<8x1xf32> to vector<8x128xf32>
      %44 = arith.subf %26, %43 : vector<8x128xf32>
      %45 = vector.broadcast %42 : vector<8x1xf32> to vector<8x128xf32>
      %46 = arith.mulf %44, %45 : vector<8x128xf32>
      %c0_28 = arith.constant 0 : index
      %c0_29 = arith.constant 0 : index
      %47 = vector.load %arg7[%c0_28, %c0_29] : memref<1x128xf32, #tpu.memory_space<vmem>>, vector<1x128xf32>
      %48 = vector.broadcast %47 : vector<1x128xf32> to vector<8x128xf32>
      %49 = arith.mulf %46, %48 : vector<8x128xf32>
      %c0_30 = arith.constant 0 : index
      %c0_31 = arith.constant 0 : index
      %50 = vector.load %arg8[%c0_30, %c0_31] : memref<1x128xf32, #tpu.memory_space<vmem>>, vector<1x128xf32>
      %51 = vector.broadcast %50 : vector<1x128xf32> to vector<8x128xf32>
      %52 = arith.addf %49, %51 : vector<8x128xf32>
      %c0_32 = arith.constant 0 : index
      %c0_33 = arith.constant 0 : index
      %53 = vector.load %arg9[%c0_32, %c0_33] : memref<8x128xf32, #tpu.memory_space<vmem>>, vector<8x128xf32>
      tpu.vector_store %arg9[%c0_32, %c0_33], %52 {strides = array<i32>} : memref<8x128xf32, #tpu.memory_space<vmem>>, vector<8x128xf32>,
    } else {
    }
    return
  }
  func.func @transform_0(%arg0: i32, %arg1: i32) -> (i32, i32) {
    %c0_i32 = arith.constant 0 : i32
    %c0_i32_0 = arith.constant 0 : i32
    return %arg0, %c0_i32 : i32, i32
  }
  func.func @transform_1(%arg0: i32, %arg1: i32) -> (i32, i32) {
    %c0_i32 = arith.constant 0 : i32
    %c0_i32_0 = arith.constant 0 : i32
    return %c0_i32, %arg1 : i32, i32
  }
  func.func @transform_2(%arg0: i32, %arg1: i32) -> (i32, i32) {
    %c0_i32 = arith.constant 0 : i32
    %c0_i32_0 = arith.constant 0 : i32
    return %c0_i32, %arg1 : i32, i32
  }
  func.func @transform_3(%arg0: i32, %arg1: i32) -> (i32, i32) {
    %c0_i32 = arith.constant 0 : i32
    %c0_i32_0 = arith.constant 0 : i32
    return %arg1, %c0_i32 : i32, i32
  }
  func.func @transform_4(%arg0: i32, %arg1: i32) -> (i32, i32) {
    %c0_i32 = arith.constant 0 : i32
    %c0_i32_0 = arith.constant 0 : i32
    %c0_i32_1 = arith.constant 0 : i32
    return %c0_i32, %c0_i32_0 : i32, i32
  }
  func.func @transform_5(%arg0: i32, %arg1: i32) -> (i32, i32) {
    %c0_i32 = arith.constant 0 : i32
    %c0_i32_0 = arith.constant 0 : i32
    %c0_i32_1 = arith.constant 0 : i32
    return %c0_i32, %c0_i32_0 : i32, i32
  }
  func.func @transform_6(%arg0: i32, %arg1: i32) -> (i32, i32) {
    %c0_i32 = arith.constant 0 : i32
    %c0_i32_0 = arith.constant 0 : i32
    %c0_i32_1 = arith.constant 0 : i32
    return %c0_i32, %c0_i32_0 : i32, i32
  }
  func.func @transform_7(%arg0: i32, %arg1: i32) -> (i32, i32) {
    %c0_i32 = arith.constant 0 : i32
    %c0_i32_0 = arith.constant 0 : i32
    return %arg0, %c0_i32 : i32, i32
  }
}

</mosaic_0001>

<bundles_post_ra>
// kernel: tpu_custom_call.1
= control target key start
LH: loop header
LB: loop body
LE: loop exit
PB: predicated region body
PF: predicated region fallthrough
CT: control target
= control target key end

     0   :  { %12 = vsyncpa [#allocation4], 0  ;;  %s1571_s0 = inlined_call_operand.hbm [shape: bf16[16,128], index: 0, kind: input, shape index: {}]   ;;  %s1572_s1 = inlined_call_operand.hbm [shape: bf16[128,256], index: 1, kind: input, shape index: {}]   ;;  %s1573_s2 = inlined_call_operand.vmem [shape: f32[1,256], index: 2, kind: input, shape index: {}]   ;;  %s1574_s3 = inlined_call_operand.hbm [shape: bf16[256,128], index: 3, kind: input, shape index: {}]   ;;  %s1575_s4 = inlined_call_operand.vmem [shape: f32[1,128], index: 4, kind: input, shape index: {}]   ;;  %s1576_s5 = inlined_call_operand.vmem [shape: f32[1,128], index: 5, kind: input, shape index: {}]   ;;  %s1577_s6 = inlined_call_operand.vmem [shape: f32[1,128], index: 6, kind: input, shape index: {}]   ;;  %s1578_s7 = inlined_call_operand.hbm [shape: f32[16,128], index: 7, kind: output, shape index: {}]  }
   0x1   :  { %14 = vsyncpa [#allocation4 + $0x1], 0 }
   0x2   :  { %15 = vsyncpa [#allocation7], 0 }
   0x3   :  { %16 = vsyncpa [#allocation5], 0 }
   0x4   :  { %18 = vsyncpa [#allocation5 + $0x1], 0  ;;  %s1304_s24 = smov 0   ;;  %s1306_s25 = smov 0  }
   0x5   :  { %s1308_s26 = smov 0   ;;  %s1310_s27 = smov 0  }
   0x6   :  { %s1312_s28 = smov 0   ;;  %s1314_s29 = smov 0  }
   0x7 LB: > { %1585 = sst [smem:[#allocation13_spill]] %s1233_s24  ;;  %s876_s30 = sadd.s32 4294967295, %s1253_s29   ;;  %s1253_s29 = sphi %s1314_s29, %s24_s29   ;;  %s1249_s28 = sphi %s1312_s28, %s1606_s28   ;;  %s1245_s27 = sphi %s1310_s27, %s1605_s27   ;;  %s1241_s26 = sphi %s1308_s26, %s1604_s26   ;;  %s1237_s25 = sphi %s1306_s25, %s1603_s25   ;;  %s1233_s24 = sphi %s1304_s24, %s1602_s24  }
   0x8   : > { %s877_s8 = sadd.s32 4294967294, %s1253_s29   ;;  %p56_p0 = scmp.ne.s32.totalorder %s1237_s25, %s1233_s24 }
   0x9   : > { %p1338_p1 = scmp.eq.s32.totalorder %s876_s30, 0  ;;  %p1342_p2 = scmp.eq.s32.totalorder %s876_s30, 1 }
   0xa   : > { %p227_p3 = scmp.eq.s32.totalorder %s877_s8, 1  ;;  %p878_p5 = scmp.ge.s32.totalorder %s1253_s29, 1 }
   0xb   : > { %s1586_s9 = scalar_select %p1338_p1, 1, 0 }
   0xc   : > { %p1348_p4 = por %p1338_p1, %p56_p0  ;;  %p1353_p6 = por %p227_p3, %p56_p0 }
   0xd   : > { %p234_p7 = scmp.lt.s32.totalorder %s1253_s29, 3  ;;  %s1255_s14 = smov [#allocation6]  }
   0xe   : > { %s1588_s11 = scalar_select %p1348_p4, 1, 0 }
   0xf   : > { %s1589_s12 = scalar_select %p1353_p6, 1, 0 }
  0x10   : > { %p1358_p8 = pnand %p878_p5, %p234_p7  ;;  %s249_s15 = sshll.u32 %s1255_s14, 4  ;;  %s1362_s15 = int_to_ptr.vmem [resolvable:$true] %s249_s15 }
  0x11   : > { %1590 = sst [smem:[#allocation14_spill]] %s1589_s12  ;;  %s1256_s17 = smov [#allocation8]  }
  0x12   : > { %p963_p9 = pneg %p1358_p8  ;;  %s273_s18 = sshll.u32 %s1256_s17, 4  ;;  %s1373_s18 = int_to_ptr.vmem [resolvable:$true] %s273_s18 }
  0x13   : > { %s1081_s21 = scalar_lea.hbm %s1572_s1, 2048 }
  0x14   : > { %p1369_p11 = pnand %p963_p9, %p1338_p1  ;;  %p1082_p12 = scmp.ne.s32.totalorder %s1572_s1, %s1081_s21 }
  0x15   : > { %p1088_p5 = scmp.lt.u32.totalorder %s1081_s21, %s1572_s1 }
  0x16   : > { %p1083_p13 = pneg %p1369_p11 }
  0x18   : > { %p1084_p0 = pnand %p1083_p13, %p1082_p12 }
  0x1a   : > { %p1085_p3 = pneg %p1084_p0 }
  0x1c   : > { %p1090_p7 = pnand %p1088_p5, %p1085_p3 }
  0x1e   : > { %1093 = shalt.err (!%p1090_p7)
}
  0x1f   : > { %s1094_s14 = scalar_lea.vmem %s1362_s15, 2048  ;;  %p1102_p1 = scmp.lt.s32.totalorder %s1362_s15, %s1362_s15 }
  0x20   : > { %p1095_p9 = scmp.ne.s32.totalorder %s1362_s15, %s1094_s14  ;;  %p1103_p12 = scmp.lt.s32.totalorder %s1094_s14, %s1094_s14 }
  0x22   : > { %p1097_p10 = pnand %p1095_p9, %p1083_p13  ;;  %p1104_p0 = por %p1103_p12, %p1102_p1 }
  0x24   : > { %p1098_p6 = pneg %p1097_p10 }
  0x26   : > { %p1105_p4 = pnand %p1104_p0, %p1098_p6 }
  0x28   : > { %1108 = shalt.err (!%p1105_p4)
}
  0x29   : > { %s1257_s17 = smov 128   ;;  %s1258_s19 = smov 8  }
  0x2a   : > { %966 = dma.hbm_to_vmem [thread:$0]  (!%p1369_p11), %s1572_s1, 2048, %s1362_s15, [#allocation7], %s1257_s17, %s1257_s17, %s1258_s19  }
  0x2b   : > { %s1109_s30 = scalar_lea.hbm %s1574_s3, 2048 }
  0x2c   : > { %p1110_p1 = scmp.ne.s32.totalorder %s1574_s3, %s1109_s30  ;;  %p1116_p10 = scmp.lt.u32.totalorder %s1109_s30, %s1574_s3 }
  0x2e   : > { %p1112_p4 = pnand %p1110_p1, %p1083_p13 }
  0x30   : > { %p1113_p6 = pneg %p1112_p4 }
  0x32   : > { %p1118_p3 = pnand %p1116_p10, %p1113_p6 }
  0x34   : > { %1121 = shalt.err (!%p1118_p3)
}
  0x35   : > { %s1122_s15 = scalar_lea.vmem %s1373_s18, 2048  ;;  %p1130_p12 = scmp.lt.s32.totalorder %s1373_s18, %s1373_s18 }
  0x36   : > { %p1123_p5 = scmp.ne.s32.totalorder %s1373_s18, %s1122_s15  ;;  %p1131_p0 = scmp.lt.s32.totalorder %s1122_s15, %s1122_s15 }
  0x38   : > { %p1125_p7 = pnand %p1123_p5, %p1083_p13  ;;  %p1132_p1 = por %p1131_p0, %p1130_p12 }
  0x3a   : > { %p1126_p9 = pneg %p1125_p7 }
  0x3c   : > { %p1133_p4 = pnand %p1132_p1, %p1126_p9 }
  0x3e   : > { %1136 = shalt.err (!%p1133_p4)
}
  0x3f   : > { %s1259_s24 = smov 64   ;;  %s1260_s12 = smov 4  }
  0x40   : > { %969 = dma.hbm_to_vmem [thread:$0]  (!%p1369_p11), %s1574_s3, 2048, %s1373_s18, [#allocation7], %s1259_s24, %s1259_s24, %s1260_s12  }
  0x41   : > { %s36_s20 = sadd.s32 1, %s1249_s28  ;;  %s43_s21 = sadd.s32 1, %s1241_s26 }
  0x42   : > { %p38_p13 = scmp.ge.s32.totalorder %s36_s20, 2  ;;  %p50_p6 = scmp.ne.s32.totalorder %s1241_s26, %s1237_s25 }
  0x43   : > { %p51_p10 = scmp.eq.s32.totalorder %s1253_s29, 0  ;;  %p980_p3 = scmp.lt.s32.totalorder %s1253_s29, 2 }
  0x44   : > { %s1608_s20 = smov (%p38_p13, %s36_s20), 0  ;;  %p1437_p7 = por %p1342_p2, %p50_p6 }
  0x45   : > { %p52_p5 = por %p51_p10, %p50_p6  ;;  %s40_s16 = ssub.s32 %s1249_s28, %s1608_s20 }
  0x46   : > { %s1593_s22 = scalar_select %p1437_p7, 1, 0 }
  0x47   : > { %s296_s23 = sand.u32 1, %s1241_s26   ;;  %p41_p9 = scmp.eq.s32.totalorder %s40_s16, 0 }
  0x48   : > { %s883_s18 = sshll.u32 %s296_s23, 2  ;;  %s884_s30 = sshll.u32 %s1249_s28, 6 }
  0x49   : > { %s1446_s8 = scalar_select %p41_p9, %s1241_s26, %s43_s21  }
  0x4a   : > { %s1451_s24 = scalar_lea.hbm %s1571_s0, %s884_s30  ;;  %s300_s10 = scalar_lea.vmem [#allocation3], %s883_s18 }
  0x4b   : > { %s307_s12 = sshll.u32 %s300_s10, 4  ;;  %p1455_p2 = pnand %p980_p3, %p52_p5  ;;  %s1459_s12 = int_to_ptr.vmem [resolvable:$true] %s307_s12 }
  0x4c   : > { %s297_s19 = scalar_lea.sflag [#allocation4], %s296_s23  ;;  %s1137_s21 = scalar_lea.hbm %s1451_s24, 64 }
  0x4d   : > { %p1138_p11 = scmp.ne.s32.totalorder %s1451_s24, %s1137_s21  ;;  %p1139_p12 = pneg %p1455_p2 }
  0x4e   : > { %s1142_s30 = scalar_lea.hbm %s1571_s0, 128  ;;  %p1143_p4 = scmp.lt.u32.totalorder %s1451_s24, %s1571_s0 }
  0x4f   : > { %p1140_p0 = pnand %p1139_p12, %p1138_p11  ;;  %p1144_p13 = scmp.lt.u32.totalorder %s1142_s30, %s1137_s21 }
  0x50   : > { %p1146_p10 = scmp.lt.u32.totalorder %s1137_s21, %s1451_s24 }
  0x51   : > { %p1141_p1 = pneg %p1140_p0  ;;  %p1145_p6 = por %p1144_p13, %p1143_p4 }
  0x53   : > { %p1147_p3 = por %p1146_p10, %p1145_p6 }
  0x55   : > { %p1148_p5 = pnand %p1147_p3, %p1141_p1 }
  0x57   : > { %1151 = shalt.err (!%p1148_p5)
}
  0x58   : > { %s1152_s23 = scalar_lea.vmem %s1459_s12, 64  ;;  %s1261_s10 = smov [#allocation3]  }
  0x59   : > { %p1153_p9 = scmp.ne.s32.totalorder %s1459_s12, %s1152_s23  ;;  %s1157_s16 = sshll.u32 %s1261_s10, 4  ;;  %s1158_s16 = int_to_ptr.vmem [resolvable:$false] %s1157_s16 }
  0x5a   : > { %s1159_s18 = scalar_lea.vmem %s1158_s16, 128  ;;  %p1160_p7 = scmp.lt.s32.totalorder %s1459_s12, %s1158_s16 }
  0x5b   : > { %p1155_p11 = pnand %p1153_p9, %p1139_p12  ;;  %p1161_p4 = scmp.lt.s32.totalorder %s1159_s18, %s1152_s23 }
  0x5d   : > { %p1156_p0 = pneg %p1155_p11  ;;  %p1162_p13 = por %p1161_p4, %p1160_p7 }
  0x5f   : > { %p1163_p6 = pnand %p1162_p13, %p1156_p0 }
  0x61   : > { %1166 = shalt.err (!%p1163_p6)
}
  0x62   : > { %973 = dma.hbm_to_vmem [thread:$0]  (!%p1455_p2), %s1451_s24, 64, %s1459_s12, %s297_s19  }
  0x63   : > { %316 = sbr.rel (%p1358_p8) target bundleno = 767 (0x2ff), region = 48  ;;  %s1489_s21 = sand.u32 (!%p1358_p8), 1, %s1237_s25  }
  0x64   : > { %s886_s30 = sshll.u32 (!%p1358_p8), %s1489_s21, 2  ;;  %s319_s14 = scalar_lea.sflag (!%p1358_p8), [#allocation4], %s1489_s21 }
  0x65   : > { %s1493_s15 = scalar_lea.vmem (!%p1358_p8), [#allocation3], %s886_s30  ;;  %p1595_p7 = scmp.ne.s32.totalorder (!%p1358_p8), %s1588_s11, 0 }
  0x6a   : > { %1220 = dma.done.wait (%p1595_p7), %s319_s14, 64  }
  0x6b   : > { %1222 = vsyncadd (%p1595_p7), %s319_s14, 4294967232  ;;  %p1596_p2 = scmp.ne.s32.totalorder %s1586_s9, 0 }
  0x6d   : > { %1224 = dma.done.wait (%p1596_p2), [#allocation7], 4096  }
  0x6e   : > { %1226 = vsyncadd (%p1596_p2), [#allocation7], 4294963200  ;;  %v1262_v0 = vmov 0   ;;  %v1039_v1 = vld [vmem:[#allocation6 + $0x4] ss:$8 sps:$4 sm:$0xff]   ;;  %v1067_v15 = vld [vmem:[#allocation8 + $0x50] sm:$0xff]   ;;  %v397_v34 = vlaneseq }
  0x6f   : > { %519 = vmatprep.mubr.bf16.mxu0 %v1262_v0  ;;  %v1041_v2 = vld [vmem:[#allocation6] ss:$8 sps:$4 sm:$0xff]   ;;  %487 = vmatprep.subr.bf16.mxu0 %v1039_v1  ;;  %v1042_v3 = vld [vmem:[#allocation6 + $0x14] ss:$8 sps:$4 sm:$0xff]   ;;  %v1044_v4 = vld [vmem:[#allocation6 + $0x10] ss:$8 sps:$4 sm:$0xff]  }
  0x70   : > { %488 = vmatpush1.bf16.msra.mxu0 %v1041_v2  ;;  %v1045_v5 = vld [vmem:[#allocation6 + $0x24] ss:$8 sps:$4 sm:$0xff]   ;;  %v1047_v6 = vld [vmem:[#allocation6 + $0x20] ss:$8 sps:$4 sm:$0xff]   ;;  %v1048_v7 = vld [vmem:[#allocation6 + $0x34] ss:$8 sps:$4 sm:$0xff]  }
  0x71   : > { %489 = vmatprep.subr.bf16.mxu0 %v1042_v3  ;;  %v1050_v8 = vld [vmem:[#allocation6 + $0x30] ss:$8 sps:$4 sm:$0xff]   ;;  %v1051_v9 = vld [vmem:[#allocation6 + $0x44] ss:$8 sps:$4 sm:$0xff]   ;;  %v1053_v12 = vld [vmem:[#allocation6 + $0x40] ss:$8 sps:$4 sm:$0xff]  }
  0x72   : > { %v1063_v10 = vld [vmem:[#allocation8 + $0x40] sm:$0xff]   ;;  %v1065_v13 = vld [vmem:[#allocation8 + $0x48] sm:$0xff]   ;;  %v1054_v16 = vld [vmem:[#allocation6 + $0x54] ss:$8 sps:$4 sm:$0xff]   ;;  %v398_v35 = vshrl.u32 %v397_v34, 7  ;;  %s889_s12 = sshll.u32 %s1489_s21, 3 }
  0x73   : > { %v1064_v11 = vld [vmem:[#allocation8] sm:$0xff]   ;;  %929 = vmatprep.subr.bf16.mxu1 %v1063_v10  ;;  %v1066_v14 = vld [vmem:[#allocation8 + $0x8] sm:$0xff]   ;;  %v1056_v17 = vld [vmem:[#allocation6 + $0x50] ss:$8 sps:$4 sm:$0xff]   ;;  %s926_s16 = sshll.u32 %s1245_s27, 7  ;;  %s364_s18 = scalar_lea.vmem [#allocation9], %s889_s12 }
  0x74   : > { %490 = vmatpush1.bf16.msra.mxu0 %v1044_v4  ;;  %930 = vmatpush3.bf16.msra.mxu1 %v1064_v11  ;;  %v1068_v18 = vld [vmem:[#allocation8 + $0x10] sm:$0xff]   ;;  %v1069_v19 = vld [vmem:[#allocation8 + $0x58] sm:$0xff]   ;;  %v1057_v20 = vld [vmem:[#allocation6 + $0x64] ss:$8 sps:$4 sm:$0xff]   ;;  %v399_v36 = vsub.s32 0, %v398_v35  ;;  %v403_v38 = vsub.s32 1, %v398_v35  ;;  %s1522_s9 = scalar_lea.hbm %s1578_s7, %s926_s16 }
  0x75   : > { %491 = vmatprep.subr.bf16.mxu0 %v1045_v5  ;;  %931 = vmatprep.subr.bf16.mxu1 %v1065_v13  ;;  %v1059_v21 = vld [vmem:[#allocation6 + $0x60] ss:$8 sps:$4 sm:$0xff]   ;;  %v1060_v22 = vld [vmem:[#allocation6 + $0x74] ss:$8 sps:$4 sm:$0xff]   ;;  %v1062_v26 = vld [vmem:[#allocation6 + $0x70] ss:$8 sps:$4 sm:$0xff]  }
  0x76   : > { %v1070_v23 = vld [vmem:[#allocation8 + $0x18] sm:$0xff]   ;;  %v1071_v24 = vld [vmem:[#allocation8 + $0x60] sm:$0xff]   ;;  %v1073_v27 = vld [vmem:[#allocation8 + $0x68] sm:$0xff]   ;;  %s763_s30 = sshll.u32 %s364_s18, 4  ;;  %s750_s11 = scalar_lea.sflag [#allocation5], %s1489_s21  ;;  %s1524_s30 = int_to_ptr.vmem [resolvable:$true] %s763_s30 }
  0x77   : > { %v1072_v25 = vld [vmem:[#allocation8 + $0x20] sm:$0xff]   ;;  %v1074_v28 = vld [vmem:[#allocation8 + $0x28] sm:$0xff]   ;;  %v378_v29 = vld [vmem:[%s1493_s15] sm:$0xf]  ;;  %s1167_s13 = scalar_lea.vmem %s1524_s30, 128  ;;  %p1597_p12 = scmp.ne.s32.totalorder %s1593_s22, 0 }
  0x78   : > { %492 = vmatpush1.bf16.msra.mxu0 %v1047_v6  ;;  %932 = vmatpush3.bf16.msra.mxu1 %v1066_v14  ;;  %v1075_v30 = vld [vmem:[#allocation8 + $0x70] sm:$0xff]   ;;  %v1077_v32 = vld [vmem:[#allocation8 + $0x78] sm:$0xff]   ;;  %p1168_p8 = scmp.ne.s32.totalorder %s1524_s30, %s1167_s13  ;;  %s1263_s27 = smov [#allocation9]  }
  0x79   : > { %493 = vmatprep.subr.bf16.mxu0 %v1048_v7  ;;  %933 = vmatprep.subr.bf16.mxu1 %v1067_v15  ;;  %v1076_v31 = vld [vmem:[#allocation8 + $0x30] sm:$0xff]   ;;  %v1078_v33 = vld [vmem:[#allocation8 + $0x38] sm:$0xff]   ;;  %s1171_s24 = sshll.u32 %s1263_s27, 4  ;;  %s1172_s24 = int_to_ptr.vmem [resolvable:$false] %s1171_s24 }
  0x7a   : > { %v395_v37 = vld [vmem:[%s1573_s2] sm:$0x3]  ;;  %p1169_p1 = pnand %p1168_p8, %p1597_p12  ;;  %s1173_s12 = scalar_lea.vmem %s1172_s24, 256 }
  0x7b   : > { %v400_v39 = vrot.slane %v395_v37, %v399_v36  ;;  %v404_v40 = vrot.slane %v395_v37, %v403_v38  ;;  %v706_v51 = vld [vmem:[%s1493_s15] sm:$0xf]  ;;  %p1174_p3 = scmp.lt.s32.totalorder %s1524_s30, %s1172_s24  ;;  %p1175_p5 = scmp.lt.s32.totalorder %s1173_s12, %s1167_s13 }
  0x7c   : > { %494 = vmatpush1.bf16.msra.mxu0 %v1050_v8  ;;  %934 = vmatpush3.bf16.msra.mxu1 %v1068_v18  ;;  %v707_v53 = vunpack.c.l.bf16 %v706_v51  ;;  %v922_v58 = vld [vmem:[%s1575_s4] ss:$0 sm:$0xff]  ;;  %p1170_p10 = pneg %p1169_p1 }
  0x7d   : > { %495 = vmatprep.subr.bf16.mxu0 %v1051_v9  ;;  %935 = vmatprep.subr.bf16.mxu1 %v1069_v19  ;;  %v923_v8 = vld [vmem:[%s1576_s5] ss:$0 sm:$0xff]  ;;  %p1176_p9 = por %p1175_p5, %p1174_p3 }
  0x7e   : > { %v924_v10 = vld [vmem:[%s1577_s6] ss:$0 sm:$0xff] }
  0x7f   : > { %p1177_p11 = pnand %p1176_p9, %p1170_p10 }
  0x80   : > { %496 = vmatpush1.bf16.msra.mxu0 %v1053_v12  ;;  %936 = vmatpush3.bf16.msra.mxu1 %v1070_v23 }
  0x81   : > { %497 = vmatprep.subr.bf16.mxu0 %v1054_v16  ;;  %937 = vmatprep.subr.bf16.mxu1 %v1071_v24 }
  0x84   : > { %498 = vmatpush1.bf16.msra.mxu0 %v1056_v17  ;;  %938 = vmatpush3.bf16.msra.mxu1 %v1072_v25 }
  0x85   : > { %499 = vmatprep.subr.bf16.mxu0 %v1057_v20  ;;  %939 = vmatprep.subr.bf16.mxu1 %v1073_v27 }
  0x88   : > { %500 = vmatpush1.bf16.msra.mxu0 %v1059_v21  ;;  %940 = vmatpush3.bf16.msra.mxu1 %v1074_v28 }
  0x89   : > { %501 = vmatprep.subr.bf16.mxu0 %v1060_v22  ;;  %941 = vmatprep.subr.bf16.mxu1 %v1075_v30 }
  0x8c   : > { %502 = vmatpush1.bf16.msra.mxu0 %v1062_v26  ;;  %942 = vmatpush3.bf16.msra.mxu1 %v1076_v31 }
  0x8d   : > { %943 = vmatprep.subr.bf16.mxu1 %v1077_v32 }
  0x8f   : > { %520 = vmatmul.mubr.bf16.vlgmr.msra.gmra.mrb[0].mxu0 %v378_v29 }
  0x90   : > { %944 = vmatpush3.bf16.msra.mxu1 %v1078_v33 }
 0x162   : > { %v521_v41 = vpop.f32.mrb[0].mxu0 }
 0x163   : > { %v522_v42 = vadd.f32 %v521_v41, %v400_v39  ;;  %v523_v43 = vpop.f32.mrb[1].mxu0 }
 0x164   : > { %v524_v44 = vadd.f32 %v523_v43, %v404_v40  ;;  %v525_v45 = vpop.f32.mrb[2].mxu0 }
 0x165   : > { %v528_v46 = vmax.f32 %v522_v42, 0.0  ;;  %v526_v47 = vpop.f32.mrb[3].mxu0 }
 0x166   : > { %v529_v48 = vmax.f32 %v524_v44, 0.0 }
 0x167   : > { %v531_v50 = vpack.c.bf16 %v528_v46, %v528_v46 }
 0x168   : > { %v532_v49 = vpack.c.bf16 %v529_v48, %v529_v48 }
 0x16a   : > { %693 = vmatprep.mubr.bf16.mxu1 %v532_v49 }
 0x16b   : > { %694 = vmatmul.mubr.bf16.vlgmr.msra.gmra.mrb[0].mxu1 %v531_v50 }
 0x23e   : > { %v945_v52 = vpop.f32.mrb[0].mxu1 }
 0x23f   : > { %v946_v54 = vpop.f32.mrb[1].mxu1 }
 0x240   : > { %v947_v55 = vadd.f32 %v946_v54, %v945_v52  ;;  %v948_v56 = vpop.f32.mrb[2].mxu1 }
 0x241   : > { %v949_v57 = vpop.f32.mrb[3].mxu1 }
 0x242   : > { %v709_v59 = vadd.f32 %v947_v55, %v707_v53 }
 0x244   : > { %v717_v60 = vadd.f32 %v922_v58, %v709_v59 }
 0x246   : > { %718 = vadd.xlane.f32.xlu0 %v717_v60  ;;  %v720_v61 = vmul.f32 %v717_v60, %v717_v60 }
 0x24a   : > { %721 = vadd.xlane.f32.xlu0 %v720_v61 }
 0x2d3   : > { %v719_v62 = vpop.xlane.xlu0 %718 }
 0x2d4   : > { %v723_v63 = vmul.f32 0.03125, %v719_v62 }
 0x2d6   : > { %v725_v1 = vmul.f32 %v723_v63, %v723_v63  ;;  %v730_v6 = vsub.f32 %v717_v60, %v723_v63 }
 0x2d7   : > { %v722_v0 = vpop.xlane.xlu0 %721 }
 0x2d8   : > { %v724_v2 = vmul.f32 0.03125, %v722_v0 }
 0x2da   : > { %v726_v3 = vsub.f32 %v724_v2, %v725_v1 }
 0x2dc   : > { %v727_v4 = vmax.f32 %v726_v3, 0.0 }
 0x2de   : > { %v728_v5 = vadd.f32 1e-06, %v727_v4 }
 0x2e0   : > { %1079 = vrsqrt.f32 %v728_v5 }
 0x2ea   : > { %v1080_v7 = vpop.eup %1079 }
 0x2eb   : > { %v731_v9 = vmul.f32 %v1080_v7, %v730_v6 }
 0x2ed   : > { %v739_v11 = vmul.f32 %v923_v8, %v731_v9 }
 0x2ef   : > { %v747_v12 = vadd.f32 %v924_v10, %v739_v11 }
 0x2f1   : > { %748 = vst [vmem:[%s364_s18] sm:$0xff] %v747_v12 }
 0x2f2   : > { %1180 = shalt.err (!%p1177_p11)
}
 0x2f3   : > { %s1181_s21 = scalar_lea.hbm %s1522_s9, 128  ;;  %s1185_s23 = scalar_lea.hbm %s1578_s7, 256 }
 0x2f4   : > { %p1182_p0 = scmp.ne.s32.totalorder %s1522_s9, %s1181_s21  ;;  %p1186_p6 = scmp.lt.u32.totalorder %s1522_s9, %s1578_s7 }
 0x2f5   : > { %p1187_p7 = scmp.lt.u32.totalorder %s1185_s23, %s1181_s21  ;;  %p1189_p8 = scmp.lt.u32.totalorder %s1181_s21, %s1522_s9 }
 0x2f6   : > { %p1183_p4 = pnand %p1182_p0, %p1597_p12 }
 0x2f7   : > { %p1188_p2 = por %p1187_p7, %p1186_p6 }
 0x2f8   : > { %p1184_p13 = pneg %p1183_p4 }
 0x2f9   : > { %p1190_p1 = por %p1189_p8, %p1188_p2 }
 0x2fb   : > { %p1191_p10 = pnand %p1190_p1, %p1184_p13 }
 0x2fd   : > { %1194 = shalt.err (!%p1191_p10)
}
 0x2fe   : > { %961 = dma.vmem_to_hbm [thread:$0]  (%p1597_p12), %s1524_s30, 128, %s1522_s9, %s750_s11  }
 0x2ff PF: > { %s1598_s18 = sld [smem:[#allocation13_spill]]  ;;  %s1599_s14 = sld [smem:[#allocation14_spill]] }
 0x300   : > { %p1601_p5 = scmp.ge.s32.totalorder %s1253_s29, 2 }
 0x305   : > { %s775_s15 = sand.u32 1, %s1598_s18   ;;  %p1600_p3 = scmp.ne.s32.totalorder %s1599_s14, 0 }
 0x306   : > { %s776_s13 = scalar_lea.sflag [#allocation5], %s775_s15 }
 0x307   : > { %p975_p9 = pnand %p1601_p5, %p1600_p3 }
 0x309   : > { %1228 = dma.done.wait (!%p975_p9), %s776_s13, 128  }
 0x30a   : > { %1230 = vsyncadd (!%p975_p9), %s776_s13, 4294967168  ;;  %s24_s29 = sadd.s32 1, %s1253_s29   ;;  %s1602_s24 = smov %s1237_s25 }
 0x30b   : > { %p21_p11 = scmp.ge.s32.totalorder %s24_s29, 4   ;;  %s1603_s25 = smov %s1241_s26 }
 0x30c   : > { %s1604_s26 = smov %s1446_s8  ;;  %s1605_s27 = smov %s1249_s28 }
 0x30d   : > { %s1606_s28 = smov %s1608_s20  ;;  %23 = sbr.rel (!%p21_p11) target bundleno = 7 (0x7), region = 114 }
 0x314   :  { %781 = vsyncpa [#allocation4], 1 }
 0x315   :  { %783 = vsyncpa [#allocation4 + $0x1], 1 }
 0x316   :  { %784 = vsyncpa [#allocation7], 1 }
 0x317   :  { %785 = vsyncpa [#allocation5], 1 }
 0x318   :  { %787 = vsyncpa [#allocation5 + $0x1], 1 }

</bundles_post_ra>
